<compile_context>
chip_gen: v7x
topology: tpu7x:2x2x1
jax: 0.10.0
libtpu: 0.0.40
codegen_flags: <defaults>
</compile_context>

<pallas_src>
import jax
import jax.numpy as jnp
from jax.experimental import pallas as pl
from jax.experimental.pallas import tpu as pltpu


# ----------------------------------------------------------------------------
# Pallas kernel: fused fc1 -> ReLU -> (dropout=identity) -> fc2 -> ReLU -> fc3
# ----------------------------------------------------------------------------

def _mlp_kernel(x_ref, w1_ref, b1_ref, w2_ref, b2_ref, w3_ref, b3_ref, o_ref):
    # x/w* are bf16 (MXU-native); accumulate in f32; epilogues in f32.
    h1 = jnp.dot(x_ref[...], w1_ref[...], preferred_element_type=jnp.float32)
    h1 = jnp.maximum(h1 + b1_ref[...], 0.0)
    h2 = jnp.dot(h1.astype(jnp.bfloat16), w2_ref[...],
                 preferred_element_type=jnp.float32)
    h2 = jnp.maximum(h2 + b2_ref[...], 0.0)
    o_ref[...] = (jnp.dot(h2.astype(jnp.bfloat16), w3_ref[...],
                          preferred_element_type=jnp.float32) + b3_ref[...])


def mlp_head(x_flat, w1, b1, w2, b2, w3, b3, *, tm=256):
    n, d_in = x_flat.shape
    d1 = w1.shape[1]
    d2 = w2.shape[1]
    d_out = w3.shape[1]

    # Batch tile: big enough to fill (8,128) vreg tiles when N is large,
    # collapses to the full (tiny) batch when N < tm.
    tm = min(tm, n)
    grid = (pl.cdiv(n, tm),)

    # bf16 at the pallas_call boundary; biases stay f32.
    x_bf = x_flat.astype(jnp.bfloat16)
    w1_bf = w1.astype(jnp.bfloat16)
    w2_bf = w2.astype(jnp.bfloat16)
    w3_bf = w3.astype(jnp.bfloat16)

    return pl.pallas_call(
        _mlp_kernel,
        out_shape=jax.ShapeDtypeStruct((n, d_out), jnp.float32),
        grid=grid,
        in_specs=[
            pl.BlockSpec((tm, d_in), lambda i: (i, 0)),    # x: tiled over batch
            pl.BlockSpec((d_in, d1), lambda i: (0, 0)),    # weights/biases:
            pl.BlockSpec((1, d1), lambda i: (0, 0)),       #   VMEM-resident
            pl.BlockSpec((d1, d2), lambda i: (0, 0)),      #   across grid steps
            pl.BlockSpec((1, d2), lambda i: (0, 0)),
            pl.BlockSpec((d2, d_out), lambda i: (0, 0)),
            pl.BlockSpec((1, d_out), lambda i: (0, 0)),
        ],
        out_specs=pl.BlockSpec((tm, d_out), lambda i: (i, 0)),
        compiler_params=pltpu.CompilerParams(
            dimension_semantics=("parallel",)),
    )(x_bf, w1_bf, b1, w2_bf, b2, w3_bf, b3)


# ----------------------------------------------------------------------------
# Parameter construction (deterministic, PyTorch-default-like uniform init).
# Only the FC parameters are live; conv/BN parameters of layer1/layer2 never
# influence the returned logits (see semantics note above).
# ----------------------------------------------------------------------------

def init_params(key):
    ks = jax.random.split(key, 6)

    def unif(k, shape, fan_in):
        bound = 1.0 / jnp.sqrt(float(fan_in))
        return jax.random.uniform(k, shape, jnp.float32, -bound, bound)

    p = {}
    # fc1: Linear(int(32*(48+1)/2)=784, 600), fc2: Linear(600,120), fc3: Linear(120,10)
    p["fc1_w"] = unif(ks[0], (784, 600), 784)   # stored (in, out)
    p["fc1_b"] = unif(ks[1], (1, 600), 784)
    p["fc2_w"] = unif(ks[2], (600, 120), 600)
    p["fc2_b"] = unif(ks[3], (1, 120), 600)
    p["fc3_w"] = unif(ks[4], (120, 10), 120)
    p["fc3_b"] = unif(ks[5], (1, 10), 120)
    return p


# ----------------------------------------------------------------------------
# Forward pass (mirrors FashionCNN.forward's observable output)
# ----------------------------------------------------------------------------

@jax.jit
def fashion_cnn_forward(params, x_nchw):
    x = x_nchw.astype(jnp.float32)
    n = x.shape[0]
    # forward() quirk: conv branch result is discarded; only its batch size
    # (static) is used.  Flatten the ORIGINAL NCHW input exactly like
    # `input_data.view(out.size(0), -1)`.
    flat = x.reshape(n, -1)                                # (N, 784)
    return mlp_head(flat,
                    params["fc1_w"], params["fc1_b"],
                    params["fc2_w"], params["fc2_b"],
                    params["fc3_w"], params["fc3_b"])      # (N, 10)


# ----------------------------------------------------------------------------
# Reference (same bf16 quantization, plain jnp) for a correctness spot-check.
# ----------------------------------------------------------------------------

def _reference(params, x_nchw):
    x = x_nchw.astype(jnp.float32).reshape(x_nchw.shape[0], -1)
    h = jnp.dot(x.astype(jnp.bfloat16), params["fc1_w"].astype(jnp.bfloat16),
                preferred_element_type=jnp.float32)
    h = jnp.maximum(h + params["fc1_b"], 0.0)
    h = jnp.dot(h.astype(jnp.bfloat16), params["fc2_w"].astype(jnp.bfloat16),
                preferred_element_type=jnp.float32)
    h = jnp.maximum(h + params["fc2_b"], 0.0)
    return jnp.dot(h.astype(jnp.bfloat16), params["fc3_w"].astype(jnp.bfloat16),
                   preferred_element_type=jnp.float32) + params["fc3_b"]


if __name__ == "__main__":
    key = jax.random.PRNGKey(0)
    pkey, xkey, xkey2 = jax.random.split(key, 3)
    params = init_params(pkey)

    # Fashion-MNIST-like input implied by the module: batch=2, 1 channel, 28x28.
    x = jax.random.normal(xkey, (2, 1, 28, 28), dtype=jnp.float32)
    out = jax.block_until_ready(fashion_cnn_forward(params, x))
    assert out.shape == (2, 10) and out.dtype == jnp.float32
    assert bool(jnp.all(jnp.isfinite(out)))
    ref = _reference(params, x)
    assert bool(jnp.allclose(out, ref, rtol=1e-2, atol=1e-2))

    # Exercise the tiled / multi-block (and v7x dual-TensorCore) path.
    x_big = jax.random.normal(xkey2, (512, 1, 28, 28), dtype=jnp.float32)
    out_big = jax.block_until_ready(fashion_cnn_forward(params, x_big))
    assert out_big.shape == (512, 10)
    assert bool(jnp.all(jnp.isfinite(out_big)))
    assert bool(jnp.allclose(out_big, _reference(params, x_big),
                             rtol=1e-2, atol=1e-2))

    print("KERNEL_OK")
</pallas_src>

<mosaic_0001>
module attributes {stable_mosaic.version = 11 : i64} {
  func.func @_mlp_kernel(%arg0: i32, %arg1: memref<2x784xbf16, #tpu.memory_space<vmem>>, %arg2: memref<784x600xbf16, #tpu.memory_space<vmem>>, %arg3: memref<1x600xf32, #tpu.memory_space<vmem>>, %arg4: memref<600x120xbf16, #tpu.memory_space<vmem>>, %arg5: memref<1x120xf32, #tpu.memory_space<vmem>>, %arg6: memref<120x10xbf16, #tpu.memory_space<vmem>>, %arg7: memref<1x10xf32, #tpu.memory_space<vmem>>, %arg8: memref<2x10xf32, #tpu.memory_space<vmem>>) attributes {dimension_semantics = [#tpu.dimension_semantics<parallel>], iteration_bounds = array<i64: 1>, scalar_prefetch = 0 : i64, scratch_operands = 0 : i64, tpu.core_type = #tpu.core_type<tc>, window_params = [{transform_indices = @transform_0, window_bounds = array<i64: 2, 784>}, {pipeline_mode = #tpu.pipeline_mode<synchronous>, transform_indices = @transform_1, window_bounds = array<i64: 784, 600>}, {pipeline_mode = #tpu.pipeline_mode<synchronous>, transform_indices = @transform_2, window_bounds = array<i64: 1, 600>}, {pipeline_mode = #tpu.pipeline_mode<synchronous>, transform_indices = @transform_3, window_bounds = array<i64: 600, 120>}, {pipeline_mode = #tpu.pipeline_mode<synchronous>, transform_indices = @transform_4, window_bounds = array<i64: 1, 120>}, {pipeline_mode = #tpu.pipeline_mode<synchronous>, transform_indices = @transform_5, window_bounds = array<i64: 120, 10>}, {pipeline_mode = #tpu.pipeline_mode<synchronous>, transform_indices = @transform_6, window_bounds = array<i64: 1, 10>}, {transform_indices = @transform_7, window_bounds = array<i64: 2, 10>}]} {
    %c0 = arith.constant 0 : index
    %c0_0 = arith.constant 0 : index
    %0 = vector.load %arg1[%c0, %c0_0] : memref<2x784xbf16, #tpu.memory_space<vmem>>, vector<2x784xbf16>
    %c0_1 = arith.constant 0 : index
    %c0_2 = arith.constant 0 : index
    %1 = vector.load %arg2[%c0_1, %c0_2] : memref<784x600xbf16, #tpu.memory_space<vmem>>, vector<784x600xbf16>
    %cst = arith.constant dense<0.000000e+00> : vector<2x600xf32>
    %2 = tpu.matmul %0, %1, %cst {dimension_numbers = #tpu.dot_dimension_numbers<[1], [0], [0], [1], [0, 0, 1, 1], [], []>} : vector<2x784xbf16>, vector<784x600xbf16>, vector<2x600xf32> -> vector<2x600xf32>
    %c0_3 = arith.constant 0 : index
    %c0_4 = arith.constant 0 : index
    %3 = vector.load %arg3[%c0_3, %c0_4] : memref<1x600xf32, #tpu.memory_space<vmem>>, vector<1x600xf32>
    %4 = vector.broadcast %3 : vector<1x600xf32> to vector<2x600xf32>
    %5 = arith.addf %2, %4 : vector<2x600xf32>
    %cst_5 = arith.constant 0.000000e+00 : f32
    %6 = vector.broadcast %cst_5 : f32 to vector<2x600xf32>
    %7 = arith.maximumf %5, %6 : vector<2x600xf32>
    %8 = arith.truncf %7 : vector<2x600xf32> to vector<2x600xbf16>
    %c0_6 = arith.constant 0 : index
    %c0_7 = arith.constant 0 : index
    %9 = vector.load %arg4[%c0_6, %c0_7] : memref<600x120xbf16, #tpu.memory_space<vmem>>, vector<600x120xbf16>
    %cst_8 = arith.constant dense<0.000000e+00> : vector<2x120xf32>
    %10 = tpu.matmul %8, %9, %cst_8 {dimension_numbers = #tpu.dot_dimension_numbers<[1], [0], [0], [1], [0, 0, 1, 1], [], []>} : vector<2x600xbf16>, vector<600x120xbf16>, vector<2x120xf32> -> vector<2x120xf32>
    %c0_9 = arith.constant 0 : index
    %c0_10 = arith.constant 0 : index
    %11 = vector.load %arg5[%c0_9, %c0_10] : memref<1x120xf32, #tpu.memory_space<vmem>>, vector<1x120xf32>
    %12 = vector.broadcast %11 : vector<1x120xf32> to vector<2x120xf32>
    %13 = arith.addf %10, %12 : vector<2x120xf32>
    %cst_11 = arith.constant 0.000000e+00 : f32
    %14 = vector.broadcast %cst_11 : f32 to vector<2x120xf32>
    %15 = arith.maximumf %13, %14 : vector<2x120xf32>
    %16 = arith.truncf %15 : vector<2x120xf32> to vector<2x120xbf16>
    %c0_12 = arith.constant 0 : index
    %c0_13 = arith.constant 0 : index
    %17 = vector.load %arg6[%c0_12, %c0_13] : memref<120x10xbf16, #tpu.memory_space<vmem>>, vector<120x10xbf16>
    %cst_14 = arith.constant dense<0.000000e+00> : vector<2x10xf32>
    %18 = tpu.matmul %16, %17, %cst_14 {dimension_numbers = #tpu.dot_dimension_numbers<[1], [0], [0], [1], [0, 0, 1, 1], [], []>} : vector<2x120xbf16>, vector<120x10xbf16>, vector<2x10xf32> -> vector<2x10xf32>
    %c0_15 = arith.constant 0 : index
    %c0_16 = arith.constant 0 : index
    %19 = vector.load %arg7[%c0_15, %c0_16] : memref<1x10xf32, #tpu.memory_space<vmem>>, vector<1x10xf32>
    %20 = vector.broadcast %19 : vector<1x10xf32> to vector<2x10xf32>
    %21 = arith.addf %18, %20 : vector<2x10xf32>
    %c0_17 = arith.constant 0 : index
    %c0_18 = arith.constant 0 : index
    %22 = vector.load %arg8[%c0_17, %c0_18] : memref<2x10xf32, #tpu.memory_space<vmem>>, vector<2x10xf32>
    tpu.vector_store %arg8[%c0_17, %c0_18], %21 {strides = array<i32>} : memref<2x10xf32, #tpu.memory_space<vmem>>, vector<2x10xf32>,
    return
  }
  func.func @transform_0(%arg0: i32) -> (i32, i32) {
    %c0_i32 = arith.constant 0 : i32
    %c0_i32_0 = arith.constant 0 : i32
    return %arg0, %c0_i32 : i32, i32
  }
  func.func @transform_1(%arg0: i32) -> (i32, i32) {
    %c0_i32 = arith.constant 0 : i32
    %c0_i32_0 = arith.constant 0 : i32
    %c0_i32_1 = arith.constant 0 : i32
    return %c0_i32, %c0_i32_0 : i32, i32
  }
  func.func @transform_2(%arg0: i32) -> (i32, i32) {
    %c0_i32 = arith.constant 0 : i32
    %c0_i32_0 = arith.constant 0 : i32
    %c0_i32_1 = arith.constant 0 : i32
    return %c0_i32, %c0_i32_0 : i32, i32
  }
  func.func @transform_3(%arg0: i32) -> (i32, i32) {
    %c0_i32 = arith.constant 0 : i32
    %c0_i32_0 = arith.constant 0 : i32
    %c0_i32_1 = arith.constant 0 : i32
    return %c0_i32, %c0_i32_0 : i32, i32
  }
  func.func @transform_4(%arg0: i32) -> (i32, i32) {
    %c0_i32 = arith.constant 0 : i32
    %c0_i32_0 = arith.constant 0 : i32
    %c0_i32_1 = arith.constant 0 : i32
    return %c0_i32, %c0_i32_0 : i32, i32
  }
  func.func @transform_5(%arg0: i32) -> (i32, i32) {
    %c0_i32 = arith.constant 0 : i32
    %c0_i32_0 = arith.constant 0 : i32
    %c0_i32_1 = arith.constant 0 : i32
    return %c0_i32, %c0_i32_0 : i32, i32
  }
  func.func @transform_6(%arg0: i32) -> (i32, i32) {
    %c0_i32 = arith.constant 0 : i32
    %c0_i32_0 = arith.constant 0 : i32
    %c0_i32_1 = arith.constant 0 : i32
    return %c0_i32, %c0_i32_0 : i32, i32
  }
  func.func @transform_7(%arg0: i32) -> (i32, i32) {
    %c0_i32 = arith.constant 0 : i32
    %c0_i32_0 = arith.constant 0 : i32
    return %arg0, %c0_i32 : i32, i32
  }
}

</mosaic_0001>

<bundles_post_ra>
// kernel: fashion_cnn_forward.1
= control target key start
LH: loop header
LB: loop body
LE: loop exit
PB: predicated region body
PF: predicated region fallthrough
CT: control target
= control target key end

     0   :  { %v325_v1 = vlaneseq  ;;  %v3661_v3 = vmov 0   ;;  %v3662_v7 = vmov 1966171168   ;;  %vm1679_vm0 = vcmask 130048   ;;  %s4704_s0 = inlined_call_operand.vmem [shape: bf16[2,784], index: 0, kind: input, shape index: {}]   ;;  %s4705_s1 = inlined_call_operand.vmem [shape: bf16[784,600], index: 1, kind: input, shape index: {}]   ;;  %s4706_s2 = inlined_call_operand.vmem [shape: f32[1,600], index: 2, kind: input, shape index: {}]   ;;  %s4707_s3 = inlined_call_operand.vmem [shape: bf16[600,120], index: 3, kind: input, shape index: {}]   ;;  %s4708_s4 = inlined_call_operand.vmem [shape: f32[1,120], index: 4, kind: input, shape index: {}]   ;;  %s4709_s5 = inlined_call_operand.vmem [shape: bf16[120,10], index: 5, kind: input, shape index: {}]   ;;  %s4710_s6 = inlined_call_operand.vmem [shape: f32[1,10], index: 6, kind: input, shape index: {}]   ;;  %s4711_s7 = inlined_call_operand.hbm [shape: f32[2,10], index: 7, kind: output, shape index: {}]  }
   0x1   :  { %v3247_v0 = vld [vmem:[%s4705_s1 + $0x4] ss:$20 sps:$4 sm:$0xff]   ;;  %v3249_v2 = vld [vmem:[%s4705_s1] ss:$20 sps:$4 sm:$0xff]   ;;  %1838 = vmatprep.mubr.bf16.mxu1 %v3661_v3  ;;  %v3252_v5 = vld [vmem:[%s4705_s1 + $0x28] ss:$20 sps:$4 sm:$0xff]   ;;  %v353_v8 = vunpack.c.l.s4 %v3662_v7 }
   0x2   :  { %1683 = vmatprep.subr.bf16.mxu0 %v3247_v0  ;;  %v3250_v4 = vld [vmem:[%s4705_s1 + $0x2c] ss:$20 sps:$4 sm:$0xff]   ;;  %v3719_v6 = vshrl.u32 %v325_v1, 7  ;;  %v3253_v9 = vld [vmem:[%s4705_s1 + $0x784] ss:$20 sps:$4 sm:$0xff]  }
   0x3   :  { %1684 = vmatpush1.bf16.msra.mxu0 %v3249_v2  ;;  %v3255_v10 = vld [vmem:[%s4705_s1 + $0x780] ss:$20 sps:$4 sm:$0xff]   ;;  %v354_v12 = vunpack.c.0.s8 %v353_v8  ;;  %1806 = vmatprep.subr.bf16.mxu1 %v3253_v9  ;;  %v3258_v16 = vld [vmem:[%s4705_s1 + $0x50] ss:$20 sps:$4 sm:$0xff]   ;;  %v3259_v21 = vld [vmem:[%s4705_s1 + $0x8] ss:$20 sps:$4 sm:$0xff]  }
   0x4   :  { %1685 = vmatprep.subr.bf16.mxu0 %v3250_v4  ;;  %v3256_v11 = vld [vmem:[%s4705_s1 + $0x54] ss:$20 sps:$4 sm:$0xff]   ;;  %1807 = vmatpush1.bf16.msra.mxu1 %v3255_v10  ;;  %v3261_v13 = vld [vmem:[%s4705_s1 + $0xc] ss:$20 sps:$4 sm:$0xff]   ;;  %v3263_v18 = vld [vmem:[%s4705_s1 + $0x7c] ss:$20 sps:$4 sm:$0xff]  }
   0x5   :  { %v28_v14 = vld [vmem:[%s4704_s0] sm:$0x7f]  ;;  %v3737_v15 = vsub.s32 %v354_v12, %v3719_v6  ;;  %1847 = vmatprep.subr.bf16.mxu1 %v3261_v13  ;;  %v3265_v24 = vld [vmem:[%s4705_s1 + $0x78] ss:$20 sps:$4 sm:$0xff]   ;;  %v3268_v28 = vld [vmem:[%s4705_s1 + $0x34] ss:$20 sps:$4 sm:$0xff]  }
   0x6   :  { %v351_v17 = vcombine.high %v28_v14, %v28_v14  ;;  %v3269_v25 = vld [vmem:[%s4705_s1 + $0xa4] ss:$20 sps:$4 sm:$0xff]   ;;  %v3271_v30 = vld [vmem:[%s4705_s1 + $0xa0] ss:$20 sps:$4 sm:$0xff]   ;;  %v3274_v32 = vld [vmem:[%s4705_s1 + $0x5c] ss:$20 sps:$4 sm:$0xff]  }
   0x7   :  { %1686 = vmatpush1.bf16.msra.mxu0 %v3252_v5  ;;  %v3746_v19 = vrot.slane %v28_v14, %v3737_v15  ;;  %v3266_v29 = vld [vmem:[%s4705_s1 + $0x30] ss:$20 sps:$4 sm:$0xff]   ;;  %v3275_v31 = vld [vmem:[%s4705_s1 + $0xcc] ss:$20 sps:$4 sm:$0xff]   ;;  %v3277_v34 = vld [vmem:[%s4705_s1 + $0xc8] ss:$20 sps:$4 sm:$0xff]  }
   0x8   :  { %1687 = vmatprep.subr.bf16.mxu0 %v3256_v11  ;;  %v3749_v20 = vrot.slane %v351_v17, %v3737_v15  ;;  %v3272_v33 = vld [vmem:[%s4705_s1 + $0x58] ss:$20 sps:$4 sm:$0xff]   ;;  %v3281_v35 = vld [vmem:[%s4705_s1 + $0xf4] ss:$20 sps:$4 sm:$0xff]   ;;  %v3283_v38 = vld [vmem:[%s4705_s1 + $0xf0] ss:$20 sps:$4 sm:$0xff]  }
   0x9   :  { %v366_v22 = vcombine.high %v3746_v19, %v3746_v19  ;;  %v3280_v36 = vld [vmem:[%s4705_s1 + $0x84] ss:$20 sps:$4 sm:$0xff]   ;;  %v3278_v37 = vld [vmem:[%s4705_s1 + $0x80] ss:$20 sps:$4 sm:$0xff]   ;;  %v3287_v39 = vld [vmem:[%s4705_s1 + $0x11c] ss:$20 sps:$4 sm:$0xff]   ;;  %v3929_v17 = vrot.slane %v3746_v19, %v3737_v15 }
   0xa   :  { %v3758_v23 = vrot.slane %v3749_v20, %v3737_v15  ;;  %v3286_v40 = vld [vmem:[%s4705_s1 + $0xac] ss:$20 sps:$4 sm:$0xff]   ;;  %v3284_v41 = vld [vmem:[%s4705_s1 + $0xa8] ss:$20 sps:$4 sm:$0xff]   ;;  %v3293_v43 = vld [vmem:[%s4705_s1 + $0x144] ss:$20 sps:$4 sm:$0xff]  }
   0xb   :  { %1688 = vmatpush1.bf16.msra.mxu0 %v3258_v16  ;;  %v3767_v26 = vrot.slane %v366_v22, %v3737_v15  ;;  %v3289_v42 = vld [vmem:[%s4705_s1 + $0x118] ss:$20 sps:$4 sm:$0xff]   ;;  %v3292_v44 = vld [vmem:[%s4705_s1 + $0xd4] ss:$20 sps:$4 sm:$0xff]   ;;  %v3290_v45 = vld [vmem:[%s4705_s1 + $0xd0] ss:$20 sps:$4 sm:$0xff]  }
   0xc   :  { %1689 = vmatprep.subr.bf16.mxu0 %v3263_v18  ;;  %v3771_v27 = vcombine.high %v3758_v23, %v3758_v23  ;;  %v3295_v46 = vld [vmem:[%s4705_s1 + $0x140] ss:$20 sps:$4 sm:$0xff]   ;;  %v3298_v48 = vld [vmem:[%s4705_s1 + $0xfc] ss:$20 sps:$4 sm:$0xff]   ;;  %v3296_v49 = vld [vmem:[%s4705_s1 + $0xf8] ss:$20 sps:$4 sm:$0xff]  }
   0xd   :  { %1715 = vmatprep.mubr.bf16.mxu0 %v3767_v26  ;;  %v3299_v47 = vld [vmem:[%s4705_s1 + $0x16c] ss:$20 sps:$4 sm:$0xff]   ;;  %v3301_v50 = vld [vmem:[%s4705_s1 + $0x168] ss:$20 sps:$4 sm:$0xff]   ;;  %v3304_v52 = vld [vmem:[%s4705_s1 + $0x124] ss:$20 sps:$4 sm:$0xff]  }
   0xe   :  { %2993 = vmatmul.mubr.msk.bf16.vlgmr.msra.gmra.mrb[0].mxu1 %vm1679_vm0, %v3771_v27  ;;  %v3305_v51 = vld [vmem:[%s4705_s1 + $0x194] ss:$20 sps:$4 sm:$0xff]   ;;  %v3307_v54 = vld [vmem:[%s4705_s1 + $0x190] ss:$20 sps:$4 sm:$0xff]   ;;  %v3310_v56 = vld [vmem:[%s4705_s1 + $0x14c] ss:$20 sps:$4 sm:$0xff]  }
   0xf   :  { %1690 = vmatpush1.bf16.msra.mxu0 %v3265_v24  ;;  %1848 = vmatpush1.bf16.msra.mxu1 %v3259_v21  ;;  %v3302_v53 = vld [vmem:[%s4705_s1 + $0x120] ss:$20 sps:$4 sm:$0xff]   ;;  %v3311_v55 = vld [vmem:[%s4705_s1 + $0x1bc] ss:$20 sps:$4 sm:$0xff]   ;;  %v3313_v58 = vld [vmem:[%s4705_s1 + $0x1b8] ss:$20 sps:$4 sm:$0xff]   ;;  %v3936_v21 = vcombine.high %v3767_v26, %v3767_v26  ;;  %v367_v24 = vcombine.high %v3749_v20, %v3749_v20 }
  0x10   :  { %1691 = vmatprep.subr.bf16.mxu0 %v3269_v25  ;;  %1849 = vmatprep.subr.bf16.mxu1 %v3268_v28  ;;  %v3308_v57 = vld [vmem:[%s4705_s1 + $0x148] ss:$20 sps:$4 sm:$0xff]   ;;  %v3317_v59 = vld [vmem:[%s4705_s1 + $0x1e4] ss:$20 sps:$4 sm:$0xff]   ;;  %v3319_v62 = vld [vmem:[%s4705_s1 + $0x1e0] ss:$20 sps:$4 sm:$0xff]  }
  0x11   :  { %1879 = vmatprep.mubr.bf16.mxu1 %v3767_v26  ;;  %v3316_v60 = vld [vmem:[%s4705_s1 + $0x174] ss:$20 sps:$4 sm:$0xff]   ;;  %v3314_v61 = vld [vmem:[%s4705_s1 + $0x170] ss:$20 sps:$4 sm:$0xff]   ;;  %v3323_v63 = vld [vmem:[%s4705_s1 + $0x20c] ss:$20 sps:$4 sm:$0xff]   ;;  %v3951_v28 = vrot.slane %v367_v24, %v3737_v15 }
  0x12   :  { %v3322_v0 = vld [vmem:[%s4705_s1 + $0x19c] ss:$20 sps:$4 sm:$0xff]   ;;  %v3320_v1 = vld [vmem:[%s4705_s1 + $0x198] ss:$20 sps:$4 sm:$0xff]   ;;  %v3329_v4 = vld [vmem:[%s4705_s1 + $0x234] ss:$20 sps:$4 sm:$0xff]  }
  0x13   :  { %1692 = vmatpush1.bf16.msra.mxu0 %v3271_v30  ;;  %1850 = vmatpush1.bf16.msra.mxu1 %v3266_v29  ;;  %v3325_v2 = vld [vmem:[%s4705_s1 + $0x208] ss:$20 sps:$4 sm:$0xff]   ;;  %v3328_v5 = vld [vmem:[%s4705_s1 + $0x1c4] ss:$20 sps:$4 sm:$0xff]   ;;  %v3326_v7 = vld [vmem:[%s4705_s1 + $0x1c0] ss:$20 sps:$4 sm:$0xff]  }
  0x14   :  { %1693 = vmatprep.subr.bf16.mxu0 %v3275_v31  ;;  %1851 = vmatprep.subr.bf16.mxu1 %v3274_v32  ;;  %v3331_v8 = vld [vmem:[%s4705_s1 + $0x230] ss:$20 sps:$4 sm:$0xff]   ;;  %v3334_v10 = vld [vmem:[%s4705_s1 + $0x1ec] ss:$20 sps:$4 sm:$0xff]   ;;  %v3332_v11 = vld [vmem:[%s4705_s1 + $0x1e8] ss:$20 sps:$4 sm:$0xff]  }
  0x15   :  { %v3335_v9 = vld [vmem:[%s4705_s1 + $0x25c] ss:$20 sps:$4 sm:$0xff]   ;;  %v3337_v12 = vld [vmem:[%s4705_s1 + $0x258] ss:$20 sps:$4 sm:$0xff]   ;;  %v3340_v14 = vld [vmem:[%s4705_s1 + $0x214] ss:$20 sps:$4 sm:$0xff]  }
  0x16   :  { %v3343_v13 = vld [vmem:[%s4705_s1 + $0x284] ss:$20 sps:$4 sm:$0xff]   ;;  %v3341_v18 = vld [vmem:[%s4705_s1 + $0x280] ss:$20 sps:$4 sm:$0xff]   ;;  %v3346_v19 = vld [vmem:[%s4705_s1 + $0x23c] ss:$20 sps:$4 sm:$0xff]  }
  0x17   :  { %1694 = vmatpush1.bf16.msra.mxu0 %v3277_v34  ;;  %1852 = vmatpush1.bf16.msra.mxu1 %v3272_v33  ;;  %v3338_v16 = vld [vmem:[%s4705_s1 + $0x210] ss:$20 sps:$4 sm:$0xff]   ;;  %v3349_v22 = vld [vmem:[%s4705_s1 + $0x2ac] ss:$20 sps:$4 sm:$0xff]   ;;  %v3347_v29 = vld [vmem:[%s4705_s1 + $0x2a8] ss:$20 sps:$4 sm:$0xff]  }
  0x18   :  { %1695 = vmatprep.subr.bf16.mxu0 %v3281_v35  ;;  %1853 = vmatprep.subr.bf16.mxu1 %v3280_v36  ;;  %v3344_v25 = vld [vmem:[%s4705_s1 + $0x238] ss:$20 sps:$4 sm:$0xff]   ;;  %v3355_v20 = vld [vmem:[%s4705_s1 + $0x2d4] ss:$20 sps:$4 sm:$0xff]   ;;  %v3353_v31 = vld [vmem:[%s4705_s1 + $0x2d0] ss:$20 sps:$4 sm:$0xff]  }
  0x19   :  { %v3352_v30 = vld [vmem:[%s4705_s1 + $0x264] ss:$20 sps:$4 sm:$0xff]   ;;  %v3350_v15 = vld [vmem:[%s4705_s1 + $0x260] ss:$20 sps:$4 sm:$0xff]   ;;  %v3361_v32 = vld [vmem:[%s4705_s1 + $0x2fc] ss:$20 sps:$4 sm:$0xff]  }
  0x1a   :  { %v3358_v33 = vld [vmem:[%s4705_s1 + $0x28c] ss:$20 sps:$4 sm:$0xff]   ;;  %v3356_v34 = vld [vmem:[%s4705_s1 + $0x288] ss:$20 sps:$4 sm:$0xff]   ;;  %v3367_v36 = vld [vmem:[%s4705_s1 + $0x324] ss:$20 sps:$4 sm:$0xff]  }
  0x1b   :  { %1696 = vmatpush1.bf16.msra.mxu0 %v3283_v38  ;;  %1854 = vmatpush1.bf16.msra.mxu1 %v3278_v37  ;;  %v3359_v35 = vld [vmem:[%s4705_s1 + $0x2f8] ss:$20 sps:$4 sm:$0xff]   ;;  %v3364_v37 = vld [vmem:[%s4705_s1 + $0x2b4] ss:$20 sps:$4 sm:$0xff]   ;;  %v3362_v38 = vld [vmem:[%s4705_s1 + $0x2b0] ss:$20 sps:$4 sm:$0xff]  }
  0x1c   :  { %1697 = vmatprep.subr.bf16.mxu0 %v3287_v39  ;;  %1855 = vmatprep.subr.bf16.mxu1 %v3286_v40  ;;  %v3365_v39 = vld [vmem:[%s4705_s1 + $0x320] ss:$20 sps:$4 sm:$0xff]   ;;  %v3433_v24 = vld [vmem:[%s4705_s1 + $0x4dc] ss:$20 sps:$4 sm:$0xff]  }
  0x1d   :  { %v3373_v40 = vld [vmem:[%s4705_s1 + $0x34c] ss:$20 sps:$4 sm:$0xff]  }
  0x1f   :  { %1698 = vmatpush1.bf16.msra.mxu0 %v3289_v42  ;;  %1856 = vmatpush1.bf16.msra.mxu1 %v3284_v41  ;;  %v3370_v41 = vld [vmem:[%s4705_s1 + $0x2dc] ss:$20 sps:$4 sm:$0xff]   ;;  %v3368_v42 = vld [vmem:[%s4705_s1 + $0x2d8] ss:$20 sps:$4 sm:$0xff]  }
  0x20   :  { %1699 = vmatprep.subr.bf16.mxu0 %v3293_v43  ;;  %1857 = vmatprep.subr.bf16.mxu1 %v3292_v44  ;;  %v3371_v43 = vld [vmem:[%s4705_s1 + $0x348] ss:$20 sps:$4 sm:$0xff]  }
  0x21   :  { %v3379_v44 = vld [vmem:[%s4705_s1 + $0x374] ss:$20 sps:$4 sm:$0xff]  }
  0x23   :  { %1700 = vmatpush1.bf16.msra.mxu0 %v3295_v46  ;;  %1858 = vmatpush1.bf16.msra.mxu1 %v3290_v45  ;;  %v3376_v45 = vld [vmem:[%s4705_s1 + $0x304] ss:$20 sps:$4 sm:$0xff]   ;;  %v3374_v46 = vld [vmem:[%s4705_s1 + $0x300] ss:$20 sps:$4 sm:$0xff]  }
  0x24   :  { %1701 = vmatprep.subr.bf16.mxu0 %v3299_v47  ;;  %1859 = vmatprep.subr.bf16.mxu1 %v3298_v48  ;;  %v3377_v47 = vld [vmem:[%s4705_s1 + $0x370] ss:$20 sps:$4 sm:$0xff]  }
  0x25   :  { %v3385_v48 = vld [vmem:[%s4705_s1 + $0x39c] ss:$20 sps:$4 sm:$0xff]  }
  0x27   :  { %1702 = vmatpush1.bf16.msra.mxu0 %v3301_v50  ;;  %1860 = vmatpush1.bf16.msra.mxu1 %v3296_v49  ;;  %v3382_v49 = vld [vmem:[%s4705_s1 + $0x32c] ss:$20 sps:$4 sm:$0xff]   ;;  %v3380_v50 = vld [vmem:[%s4705_s1 + $0x328] ss:$20 sps:$4 sm:$0xff]  }
  0x28   :  { %1703 = vmatprep.subr.bf16.mxu0 %v3305_v51  ;;  %1861 = vmatprep.subr.bf16.mxu1 %v3304_v52  ;;  %v3383_v51 = vld [vmem:[%s4705_s1 + $0x398] ss:$20 sps:$4 sm:$0xff]  }
  0x29   :  { %v3391_v52 = vld [vmem:[%s4705_s1 + $0x3c4] ss:$20 sps:$4 sm:$0xff]  }
  0x2b   :  { %1704 = vmatpush1.bf16.msra.mxu0 %v3307_v54  ;;  %1862 = vmatpush1.bf16.msra.mxu1 %v3302_v53  ;;  %v3388_v53 = vld [vmem:[%s4705_s1 + $0x354] ss:$20 sps:$4 sm:$0xff]   ;;  %v3386_v54 = vld [vmem:[%s4705_s1 + $0x350] ss:$20 sps:$4 sm:$0xff]  }
  0x2c   :  { %1705 = vmatprep.subr.bf16.mxu0 %v3311_v55  ;;  %1863 = vmatprep.subr.bf16.mxu1 %v3310_v56  ;;  %v3389_v55 = vld [vmem:[%s4705_s1 + $0x3c0] ss:$20 sps:$4 sm:$0xff]  }
  0x2d   :  { %v3397_v56 = vld [vmem:[%s4705_s1 + $0x3ec] ss:$20 sps:$4 sm:$0xff]  }
  0x2f   :  { %1706 = vmatpush1.bf16.msra.mxu0 %v3313_v58  ;;  %1864 = vmatpush1.bf16.msra.mxu1 %v3308_v57  ;;  %v3394_v57 = vld [vmem:[%s4705_s1 + $0x37c] ss:$20 sps:$4 sm:$0xff]   ;;  %v3392_v58 = vld [vmem:[%s4705_s1 + $0x378] ss:$20 sps:$4 sm:$0xff]  }
  0x30   :  { %1707 = vmatprep.subr.bf16.mxu0 %v3317_v59  ;;  %1865 = vmatprep.subr.bf16.mxu1 %v3316_v60  ;;  %v3395_v59 = vld [vmem:[%s4705_s1 + $0x3e8] ss:$20 sps:$4 sm:$0xff]  }
  0x31   :  { %v3403_v60 = vld [vmem:[%s4705_s1 + $0x414] ss:$20 sps:$4 sm:$0xff]  }
  0x33   :  { %1708 = vmatpush1.bf16.msra.mxu0 %v3319_v62  ;;  %1866 = vmatpush1.bf16.msra.mxu1 %v3314_v61  ;;  %v3400_v61 = vld [vmem:[%s4705_s1 + $0x3a4] ss:$20 sps:$4 sm:$0xff]   ;;  %v3398_v62 = vld [vmem:[%s4705_s1 + $0x3a0] ss:$20 sps:$4 sm:$0xff]  }
  0x34   :  { %1709 = vmatprep.subr.bf16.mxu0 %v3323_v63  ;;  %1867 = vmatprep.subr.bf16.mxu1 %v3322_v0  ;;  %v3401_v63 = vld [vmem:[%s4705_s1 + $0x410] ss:$20 sps:$4 sm:$0xff]  }
  0x35   :  { %v3409_v0 = vld [vmem:[%s4705_s1 + $0x43c] ss:$20 sps:$4 sm:$0xff]  }
  0x37   :  { %1710 = vmatpush1.bf16.msra.mxu0 %v3325_v2  ;;  %1868 = vmatpush1.bf16.msra.mxu1 %v3320_v1  ;;  %v3406_v1 = vld [vmem:[%s4705_s1 + $0x3cc] ss:$20 sps:$4 sm:$0xff]   ;;  %v3404_v2 = vld [vmem:[%s4705_s1 + $0x3c8] ss:$20 sps:$4 sm:$0xff]  }
  0x38   :  { %1711 = vmatprep.subr.bf16.mxu0 %v3329_v4  ;;  %1869 = vmatprep.subr.bf16.mxu1 %v3328_v5  ;;  %v3407_v4 = vld [vmem:[%s4705_s1 + $0x438] ss:$20 sps:$4 sm:$0xff]  }
  0x39   :  { %v3415_v5 = vld [vmem:[%s4705_s1 + $0x464] ss:$20 sps:$4 sm:$0xff]  }
  0x3b   :  { %1712 = vmatpush1.bf16.msra.mxu0 %v3331_v8  ;;  %1870 = vmatpush1.bf16.msra.mxu1 %v3326_v7  ;;  %v3412_v7 = vld [vmem:[%s4705_s1 + $0x3f4] ss:$20 sps:$4 sm:$0xff]   ;;  %v3410_v8 = vld [vmem:[%s4705_s1 + $0x3f0] ss:$20 sps:$4 sm:$0xff]  }
  0x3c   :  { %1713 = vmatprep.subr.bf16.mxu0 %v3335_v9  ;;  %1871 = vmatprep.subr.bf16.mxu1 %v3334_v10  ;;  %v3413_v9 = vld [vmem:[%s4705_s1 + $0x460] ss:$20 sps:$4 sm:$0xff]  }
  0x3d   :  { %v3421_v10 = vld [vmem:[%s4705_s1 + $0x48c] ss:$20 sps:$4 sm:$0xff]  }
  0x3f   :  { %1714 = vmatpush1.bf16.msra.mxu0 %v3337_v12  ;;  %1872 = vmatpush1.bf16.msra.mxu1 %v3332_v11  ;;  %v3418_v11 = vld [vmem:[%s4705_s1 + $0x41c] ss:$20 sps:$4 sm:$0xff]   ;;  %v3416_v12 = vld [vmem:[%s4705_s1 + $0x418] ss:$20 sps:$4 sm:$0xff]  }
  0x40   :  { %1724 = vmatprep.subr.bf16.mxu0 %v3343_v13  ;;  %1873 = vmatprep.subr.bf16.mxu1 %v3340_v14  ;;  %v3419_v13 = vld [vmem:[%s4705_s1 + $0x488] ss:$20 sps:$4 sm:$0xff]  }
  0x41   :  { %v3427_v14 = vld [vmem:[%s4705_s1 + $0x4b4] ss:$20 sps:$4 sm:$0xff]  }
  0x42   :  { %1716 = vmatmul.mubr.bf16.vlgmr.msra.gmra.mrb[0].mxu0 %v3929_v17 }
  0x43   :  { %1725 = vmatpush1.bf16.msra.mxu0 %v3341_v18  ;;  %1756 = vmatprep.mubr.bf16.mxu0 %v3936_v21  ;;  %v3422_v18 = vld [vmem:[%s4705_s1 + $0x440] ss:$20 sps:$4 sm:$0xff]  }
  0x44   :  { %1874 = vmatpush1.bf16.msra.mxu1 %v3338_v16  ;;  %1726 = vmatprep.subr.bf16.mxu0 %v3349_v22  ;;  %v3424_v16 = vld [vmem:[%s4705_s1 + $0x444] ss:$20 sps:$4 sm:$0xff]  }
  0x45   :  { %1875 = vmatprep.subr.bf16.mxu1 %v3346_v19  ;;  %v3425_v22 = vld [vmem:[%s4705_s1 + $0x4b0] ss:$20 sps:$4 sm:$0xff]   ;;  %v3430_v19 = vld [vmem:[%s4705_s1 + $0x46c] ss:$20 sps:$4 sm:$0xff]  }
  0x47   :  { %1727 = vmatpush1.bf16.msra.mxu0 %v3347_v29  ;;  %v3431_v29 = vld [vmem:[%s4705_s1 + $0x4d8] ss:$20 sps:$4 sm:$0xff]  }
  0x48   :  { %1876 = vmatpush1.bf16.msra.mxu1 %v3344_v25  ;;  %1728 = vmatprep.subr.bf16.mxu0 %v3355_v20  ;;  %v3428_v25 = vld [vmem:[%s4705_s1 + $0x468] ss:$20 sps:$4 sm:$0xff]   ;;  %v3439_v20 = vld [vmem:[%s4705_s1 + $0x504] ss:$20 sps:$4 sm:$0xff]  }
  0x49   :  { %1877 = vmatprep.subr.bf16.mxu1 %v3352_v30  ;;  %v3436_v30 = vld [vmem:[%s4705_s1 + $0x494] ss:$20 sps:$4 sm:$0xff]  }
  0x4b   :  { %1729 = vmatpush1.bf16.msra.mxu0 %v3353_v31  ;;  %v4138_v31 = vcombine.high %v3929_v17, %v3929_v17 }
  0x4c   :  { %1878 = vmatpush1.bf16.msra.mxu1 %v3350_v15  ;;  %1730 = vmatprep.subr.bf16.mxu0 %v3361_v32  ;;  %v3434_v15 = vld [vmem:[%s4705_s1 + $0x490] ss:$20 sps:$4 sm:$0xff]   ;;  %v3437_v32 = vld [vmem:[%s4705_s1 + $0x500] ss:$20 sps:$4 sm:$0xff]  }
  0x4d   :  { %1888 = vmatprep.subr.bf16.mxu1 %v3358_v33  ;;  %v3445_v33 = vld [vmem:[%s4705_s1 + $0x52c] ss:$20 sps:$4 sm:$0xff]  }
  0x4f   :  { %1880 = vmatmul.mubr.bf16.vlgmr.msra.gmra.mrb[4].mxu1 %v3929_v17  ;;  %1731 = vmatpush1.bf16.msra.mxu0 %v3359_v35  ;;  %v3443_v35 = vld [vmem:[%s4705_s1 + $0x528] ss:$20 sps:$4 sm:$0xff]  }
  0x50   :  { %1889 = vmatpush1.bf16.msra.mxu1 %v3356_v34  ;;  %1732 = vmatprep.subr.bf16.mxu0 %v3367_v36  ;;  %v3442_v34 = vld [vmem:[%s4705_s1 + $0x4bc] ss:$20 sps:$4 sm:$0xff]   ;;  %v3440_v36 = vld [vmem:[%s4705_s1 + $0x4b8] ss:$20 sps:$4 sm:$0xff]  }
  0x51   :  { %1890 = vmatprep.subr.bf16.mxu1 %v3364_v37  ;;  %1920 = vmatprep.mubr.bf16.mxu1 %v3936_v21  ;;  %v3451_v37 = vld [vmem:[%s4705_s1 + $0x554] ss:$20 sps:$4 sm:$0xff]  }
  0x53   :  { %1733 = vmatpush1.bf16.msra.mxu0 %v3365_v39  ;;  %v3446_v39 = vld [vmem:[%s4705_s1 + $0x4e0] ss:$20 sps:$4 sm:$0xff]  }
  0x54   :  { %1891 = vmatpush1.bf16.msra.mxu1 %v3362_v38  ;;  %1734 = vmatprep.subr.bf16.mxu0 %v3373_v40  ;;  %v3448_v38 = vld [vmem:[%s4705_s1 + $0x4e4] ss:$20 sps:$4 sm:$0xff]  }
  0x55   :  { %1892 = vmatprep.subr.bf16.mxu1 %v3370_v41  ;;  %v3449_v40 = vld [vmem:[%s4705_s1 + $0x550] ss:$20 sps:$4 sm:$0xff]  }
  0x56   :  { %v3457_v41 = vld [vmem:[%s4705_s1 + $0x57c] ss:$20 sps:$4 sm:$0xff]  }
  0x57   :  { %1735 = vmatpush1.bf16.msra.mxu0 %v3371_v43  ;;  %v3452_v43 = vld [vmem:[%s4705_s1 + $0x508] ss:$20 sps:$4 sm:$0xff]  }
  0x58   :  { %1893 = vmatpush1.bf16.msra.mxu1 %v3368_v42  ;;  %1736 = vmatprep.subr.bf16.mxu0 %v3379_v44  ;;  %v3454_v42 = vld [vmem:[%s4705_s1 + $0x50c] ss:$20 sps:$4 sm:$0xff]  }
  0x59   :  { %1894 = vmatprep.subr.bf16.mxu1 %v3376_v45  ;;  %v3455_v44 = vld [vmem:[%s4705_s1 + $0x578] ss:$20 sps:$4 sm:$0xff]  }
  0x5a   :  { %v3463_v45 = vld [vmem:[%s4705_s1 + $0x5a4] ss:$20 sps:$4 sm:$0xff]  }
  0x5b   :  { %1737 = vmatpush1.bf16.msra.mxu0 %v3377_v47  ;;  %v3458_v47 = vld [vmem:[%s4705_s1 + $0x530] ss:$20 sps:$4 sm:$0xff]  }
  0x5c   :  { %1895 = vmatpush1.bf16.msra.mxu1 %v3374_v46  ;;  %1738 = vmatprep.subr.bf16.mxu0 %v3385_v48  ;;  %v3460_v46 = vld [vmem:[%s4705_s1 + $0x534] ss:$20 sps:$4 sm:$0xff]  }
  0x5d   :  { %1896 = vmatprep.subr.bf16.mxu1 %v3382_v49  ;;  %v3461_v48 = vld [vmem:[%s4705_s1 + $0x5a0] ss:$20 sps:$4 sm:$0xff]  }
  0x5e   :  { %v3469_v49 = vld [vmem:[%s4705_s1 + $0x5cc] ss:$20 sps:$4 sm:$0xff]  }
  0x5f   :  { %1739 = vmatpush1.bf16.msra.mxu0 %v3383_v51  ;;  %v3464_v51 = vld [vmem:[%s4705_s1 + $0x558] ss:$20 sps:$4 sm:$0xff]  }
  0x60   :  { %1897 = vmatpush1.bf16.msra.mxu1 %v3380_v50  ;;  %1740 = vmatprep.subr.bf16.mxu0 %v3391_v52  ;;  %v3466_v50 = vld [vmem:[%s4705_s1 + $0x55c] ss:$20 sps:$4 sm:$0xff]  }
  0x61   :  { %1898 = vmatprep.subr.bf16.mxu1 %v3388_v53  ;;  %v3467_v52 = vld [vmem:[%s4705_s1 + $0x5c8] ss:$20 sps:$4 sm:$0xff]  }
  0x62   :  { %v3475_v53 = vld [vmem:[%s4705_s1 + $0x5f4] ss:$20 sps:$4 sm:$0xff]  }
  0x63   :  { %1741 = vmatpush1.bf16.msra.mxu0 %v3389_v55  ;;  %v3470_v55 = vld [vmem:[%s4705_s1 + $0x580] ss:$20 sps:$4 sm:$0xff]  }
  0x64   :  { %1899 = vmatpush1.bf16.msra.mxu1 %v3386_v54  ;;  %1742 = vmatprep.subr.bf16.mxu0 %v3397_v56  ;;  %v3472_v54 = vld [vmem:[%s4705_s1 + $0x584] ss:$20 sps:$4 sm:$0xff]  }
  0x65   :  { %1900 = vmatprep.subr.bf16.mxu1 %v3394_v57  ;;  %v3473_v56 = vld [vmem:[%s4705_s1 + $0x5f0] ss:$20 sps:$4 sm:$0xff]  }
  0x66   :  { %v3481_v57 = vld [vmem:[%s4705_s1 + $0x61c] ss:$20 sps:$4 sm:$0xff]  }
  0x67   :  { %1743 = vmatpush1.bf16.msra.mxu0 %v3395_v59  ;;  %v3476_v59 = vld [vmem:[%s4705_s1 + $0x5a8] ss:$20 sps:$4 sm:$0xff]  }
  0x68   :  { %1901 = vmatpush1.bf16.msra.mxu1 %v3392_v58  ;;  %1744 = vmatprep.subr.bf16.mxu0 %v3403_v60  ;;  %v3478_v58 = vld [vmem:[%s4705_s1 + $0x5ac] ss:$20 sps:$4 sm:$0xff]  }
  0x69   :  { %1902 = vmatprep.subr.bf16.mxu1 %v3400_v61  ;;  %v3479_v60 = vld [vmem:[%s4705_s1 + $0x618] ss:$20 sps:$4 sm:$0xff]  }
  0x6a   :  { %v3487_v61 = vld [vmem:[%s4705_s1 + $0x644] ss:$20 sps:$4 sm:$0xff]  }
  0x6b   :  { %1745 = vmatpush1.bf16.msra.mxu0 %v3401_v63  ;;  %v3482_v63 = vld [vmem:[%s4705_s1 + $0x5d0] ss:$20 sps:$4 sm:$0xff]  }
  0x6c   :  { %1903 = vmatpush1.bf16.msra.mxu1 %v3398_v62  ;;  %1746 = vmatprep.subr.bf16.mxu0 %v3409_v0  ;;  %v3484_v62 = vld [vmem:[%s4705_s1 + $0x5d4] ss:$20 sps:$4 sm:$0xff]  }
  0x6d   :  { %1904 = vmatprep.subr.bf16.mxu1 %v3406_v1  ;;  %v3485_v0 = vld [vmem:[%s4705_s1 + $0x640] ss:$20 sps:$4 sm:$0xff]  }
  0x6e   :  { %v3493_v1 = vld [vmem:[%s4705_s1 + $0x66c] ss:$20 sps:$4 sm:$0xff]  }
  0x6f   :  { %1747 = vmatpush1.bf16.msra.mxu0 %v3407_v4  ;;  %v3488_v4 = vld [vmem:[%s4705_s1 + $0x5f8] ss:$20 sps:$4 sm:$0xff]  }
  0x70   :  { %1905 = vmatpush1.bf16.msra.mxu1 %v3404_v2  ;;  %1748 = vmatprep.subr.bf16.mxu0 %v3415_v5  ;;  %v3490_v2 = vld [vmem:[%s4705_s1 + $0x5fc] ss:$20 sps:$4 sm:$0xff]  }
  0x71   :  { %1906 = vmatprep.subr.bf16.mxu1 %v3412_v7  ;;  %v3491_v5 = vld [vmem:[%s4705_s1 + $0x668] ss:$20 sps:$4 sm:$0xff]  }
  0x72   :  { %v3499_v7 = vld [vmem:[%s4705_s1 + $0x694] ss:$20 sps:$4 sm:$0xff]  }
  0x73   :  { %1749 = vmatpush1.bf16.msra.mxu0 %v3413_v9  ;;  %v3494_v9 = vld [vmem:[%s4705_s1 + $0x620] ss:$20 sps:$4 sm:$0xff]  }
  0x74   :  { %1907 = vmatpush1.bf16.msra.mxu1 %v3410_v8  ;;  %1750 = vmatprep.subr.bf16.mxu0 %v3421_v10  ;;  %v3496_v8 = vld [vmem:[%s4705_s1 + $0x624] ss:$20 sps:$4 sm:$0xff]  }
  0x75   :  { %1908 = vmatprep.subr.bf16.mxu1 %v3418_v11  ;;  %v3497_v10 = vld [vmem:[%s4705_s1 + $0x690] ss:$20 sps:$4 sm:$0xff]  }
  0x76   :  { %v3505_v11 = vld [vmem:[%s4705_s1 + $0x6bc] ss:$20 sps:$4 sm:$0xff]  }
  0x77   :  { %1751 = vmatpush1.bf16.msra.mxu0 %v3419_v13  ;;  %v3500_v13 = vld [vmem:[%s4705_s1 + $0x648] ss:$20 sps:$4 sm:$0xff]  }
  0x78   :  { %1909 = vmatpush1.bf16.msra.mxu1 %v3416_v12  ;;  %1752 = vmatprep.subr.bf16.mxu0 %v3427_v14  ;;  %v3502_v12 = vld [vmem:[%s4705_s1 + $0x64c] ss:$20 sps:$4 sm:$0xff]  }
  0x79   :  { %1910 = vmatprep.subr.bf16.mxu1 %v3424_v16  ;;  %v3503_v14 = vld [vmem:[%s4705_s1 + $0x6b8] ss:$20 sps:$4 sm:$0xff]  }
  0x7a   :  { %v3511_v16 = vld [vmem:[%s4705_s1 + $0x6e4] ss:$20 sps:$4 sm:$0xff]  }
  0x7b   :  { %1753 = vmatpush1.bf16.msra.mxu0 %v3425_v22  ;;  %v3506_v22 = vld [vmem:[%s4705_s1 + $0x670] ss:$20 sps:$4 sm:$0xff]  }
  0x7c   :  { %1911 = vmatpush1.bf16.msra.mxu1 %v3422_v18  ;;  %1754 = vmatprep.subr.bf16.mxu0 %v3433_v24  ;;  %v3508_v18 = vld [vmem:[%s4705_s1 + $0x674] ss:$20 sps:$4 sm:$0xff]  }
  0x7d   :  { %1912 = vmatprep.subr.bf16.mxu1 %v3430_v19  ;;  %v3509_v24 = vld [vmem:[%s4705_s1 + $0x6e0] ss:$20 sps:$4 sm:$0xff]  }
  0x7e   :  { %v3517_v19 = vld [vmem:[%s4705_s1 + $0x70c] ss:$20 sps:$4 sm:$0xff]  }
  0x7f   :  { %1755 = vmatpush1.bf16.msra.mxu0 %v3431_v29  ;;  %v3512_v29 = vld [vmem:[%s4705_s1 + $0x698] ss:$20 sps:$4 sm:$0xff]  }
  0x80   :  { %1913 = vmatpush1.bf16.msra.mxu1 %v3428_v25  ;;  %1765 = vmatprep.subr.bf16.mxu0 %v3439_v20  ;;  %v3514_v25 = vld [vmem:[%s4705_s1 + $0x69c] ss:$20 sps:$4 sm:$0xff]  }
  0x81   :  { %1914 = vmatprep.subr.bf16.mxu1 %v3436_v30  ;;  %v3515_v20 = vld [vmem:[%s4705_s1 + $0x708] ss:$20 sps:$4 sm:$0xff]  }
  0x82   :  { %1757 = vmatmul.mubr.bf16.vlgmr.msra.gmra.mrb[0].mxu0 %v4138_v31  ;;  %v3523_v30 = vld [vmem:[%s4705_s1 + $0x734] ss:$20 sps:$4 sm:$0xff]  }
  0x83   :  { %1766 = vmatpush1.bf16.msra.mxu0 %v3437_v32  ;;  %1797 = vmatprep.mubr.bf16.mxu0 %v3951_v28  ;;  %v3518_v32 = vld [vmem:[%s4705_s1 + $0x6c0] ss:$20 sps:$4 sm:$0xff]  }
  0x84   :  { %1915 = vmatpush1.bf16.msra.mxu1 %v3434_v15  ;;  %1767 = vmatprep.subr.bf16.mxu0 %v3445_v33  ;;  %v3520_v15 = vld [vmem:[%s4705_s1 + $0x6c4] ss:$20 sps:$4 sm:$0xff]  }
  0x85   :  { %1916 = vmatprep.subr.bf16.mxu1 %v3442_v34  ;;  %v3521_v33 = vld [vmem:[%s4705_s1 + $0x730] ss:$20 sps:$4 sm:$0xff]  }
  0x86   :  { %v3529_v34 = vld [vmem:[%s4705_s1 + $0x75c] ss:$20 sps:$4 sm:$0xff]  }
  0x87   :  { %1768 = vmatpush1.bf16.msra.mxu0 %v3443_v35  ;;  %v3526_v35 = vld [vmem:[%s4705_s1 + $0x6ec] ss:$20 sps:$4 sm:$0xff]  }
  0x88   :  { %1917 = vmatpush1.bf16.msra.mxu1 %v3440_v36  ;;  %1769 = vmatprep.subr.bf16.mxu0 %v3451_v37  ;;  %v3524_v36 = vld [vmem:[%s4705_s1 + $0x6e8] ss:$20 sps:$4 sm:$0xff]   ;;  %v3527_v37 = vld [vmem:[%s4705_s1 + $0x758] ss:$20 sps:$4 sm:$0xff]  }
  0x89   :  { %1918 = vmatprep.subr.bf16.mxu1 %v3448_v38  ;;  %v3533_v38 = vld [vmem:[%s4705_s1 + $0x150] ss:$20 sps:$4 sm:$0xff]  }
  0x8b   :  { %1770 = vmatpush1.bf16.msra.mxu0 %v3449_v40  ;;  %v3530_v40 = vld [vmem:[%s4705_s1 + $0x710] ss:$20 sps:$4 sm:$0xff]  }
  0x8c   :  { %1919 = vmatpush1.bf16.msra.mxu1 %v3446_v39  ;;  %1771 = vmatprep.subr.bf16.mxu0 %v3457_v41  ;;  %v3532_v39 = vld [vmem:[%s4705_s1 + $0x714] ss:$20 sps:$4 sm:$0xff]   ;;  %v3536_v41 = vld [vmem:[%s4705_s1 + $0x73c] ss:$20 sps:$4 sm:$0xff]  }
  0x8d   :  { %1929 = vmatprep.subr.bf16.mxu1 %v3454_v42  ;;  %v3537_v42 = vld [vmem:[%s4705_s1 + $0x10] ss:$20 sps:$4 sm:$0xff]  }
  0x8f   :  { %1921 = vmatmul.mubr.bf16.vlgmr.msra.gmra.mrb[4].mxu1 %v4138_v31  ;;  %1772 = vmatpush1.bf16.msra.mxu0 %v3455_v44  ;;  %v3542_v44 = vld [vmem:[%s4705_s1 + $0x38] ss:$20 sps:$4 sm:$0xff]  }
  0x90   :  { %1930 = vmatpush1.bf16.msra.mxu1 %v3452_v43  ;;  %1773 = vmatprep.subr.bf16.mxu0 %v3463_v45  ;;  %v3538_v43 = vld [vmem:[%s4705_s1 + $0x178] ss:$20 sps:$4 sm:$0xff]  }
  0x91   :  { %1931 = vmatprep.subr.bf16.mxu1 %v3460_v46  ;;  %1961 = vmatprep.mubr.bf16.mxu1 %v3951_v28  ;;  %v3534_v45 = vld [vmem:[%s4705_s1 + $0x738] ss:$20 sps:$4 sm:$0xff]   ;;  %v3543_v46 = vld [vmem:[%s4705_s1 + $0x1a0] ss:$20 sps:$4 sm:$0xff]  }
  0x93   :  { %1774 = vmatpush1.bf16.msra.mxu0 %v3461_v48  ;;  %v3544_v48 = vld [vmem:[%s4705_s1 + $0x60] ss:$20 sps:$4 sm:$0xff]  }
  0x94   :  { %1932 = vmatpush1.bf16.msra.mxu1 %v3458_v47  ;;  %1775 = vmatprep.subr.bf16.mxu0 %v3469_v49  ;;  %v3541_v47 = vld [vmem:[%s4705_s1 + $0x764] ss:$20 sps:$4 sm:$0xff]   ;;  %v3539_v49 = vld [vmem:[%s4705_s1 + $0x760] ss:$20 sps:$4 sm:$0xff]  }
  0x95   :  { %1933 = vmatprep.subr.bf16.mxu1 %v3466_v50  ;;  %v3545_v50 = vld [vmem:[%s4705_s1 + $0x1c8] ss:$20 sps:$4 sm:$0xff]  }
  0x97   :  { %1776 = vmatpush1.bf16.msra.mxu0 %v3467_v52  ;;  %v3547_v52 = vld [vmem:[%s4705_s1 + $0x788] ss:$20 sps:$4 sm:$0xff]  }
  0x98   :  { %1934 = vmatpush1.bf16.msra.mxu1 %v3464_v51  ;;  %1777 = vmatprep.subr.bf16.mxu0 %v3475_v53  ;;  %v3546_v51 = vld [vmem:[%s4705_s1 + $0x88] ss:$20 sps:$4 sm:$0xff]   ;;  %v3550_v53 = vld [vmem:[%s4705_s1 + $0x1f0] ss:$20 sps:$4 sm:$0xff]  }
  0x99   :  { %1935 = vmatprep.subr.bf16.mxu1 %v3472_v54  ;;  %v3553_v54 = vld [vmem:[%s4705_s1 + $0x3d0] ss:$20 sps:$4 sm:$0xff]  }
  0x9b   :  { %1778 = vmatpush1.bf16.msra.mxu0 %v3473_v56  ;;  %v3552_v56 = vld [vmem:[%s4705_s1 + $0x218] ss:$20 sps:$4 sm:$0xff]  }
  0x9c   :  { %1936 = vmatpush1.bf16.msra.mxu1 %v3470_v55  ;;  %1779 = vmatprep.subr.bf16.mxu0 %v3481_v57  ;;  %v3551_v55 = vld [vmem:[%s4705_s1 + $0xb0] ss:$20 sps:$4 sm:$0xff]   ;;  %v3554_v57 = vld [vmem:[%s4705_s1 + $0xd8] ss:$20 sps:$4 sm:$0xff]  }
  0x9d   :  { %1937 = vmatprep.subr.bf16.mxu1 %v3478_v58  ;;  %v3556_v58 = vld [vmem:[%s4705_s1 + $0x240] ss:$20 sps:$4 sm:$0xff]  }
  0x9f   :  { %1780 = vmatpush1.bf16.msra.mxu0 %v3479_v60 }
  0xa0   :  { %1938 = vmatpush1.bf16.msra.mxu1 %v3476_v59  ;;  %1781 = vmatprep.subr.bf16.mxu0 %v3487_v61 }
  0xa1   :  { %1939 = vmatprep.subr.bf16.mxu1 %v3484_v62 }
  0xa3   :  { %1782 = vmatpush1.bf16.msra.mxu0 %v3485_v0 }
  0xa4   :  { %1940 = vmatpush1.bf16.msra.mxu1 %v3482_v63  ;;  %1783 = vmatprep.subr.bf16.mxu0 %v3493_v1 }
  0xa5   :  { %1941 = vmatprep.subr.bf16.mxu1 %v3490_v2 }
  0xa7   :  { %1784 = vmatpush1.bf16.msra.mxu0 %v3491_v5 }
  0xa8   :  { %1942 = vmatpush1.bf16.msra.mxu1 %v3488_v4  ;;  %1785 = vmatprep.subr.bf16.mxu0 %v3499_v7 }
  0xa9   :  { %1943 = vmatprep.subr.bf16.mxu1 %v3496_v8 }
  0xab   :  { %1786 = vmatpush1.bf16.msra.mxu0 %v3497_v10 }
  0xac   :  { %1944 = vmatpush1.bf16.msra.mxu1 %v3494_v9  ;;  %1787 = vmatprep.subr.bf16.mxu0 %v3505_v11 }
  0xad   :  { %1945 = vmatprep.subr.bf16.mxu1 %v3502_v12 }
  0xaf   :  { %1788 = vmatpush1.bf16.msra.mxu0 %v3503_v14 }
  0xb0   :  { %1946 = vmatpush1.bf16.msra.mxu1 %v3500_v13  ;;  %1789 = vmatprep.subr.bf16.mxu0 %v3511_v16 }
  0xb1   :  { %1947 = vmatprep.subr.bf16.mxu1 %v3508_v18 }
  0xb3   :  { %1790 = vmatpush1.bf16.msra.mxu0 %v3509_v24 }
  0xb4   :  { %1948 = vmatpush1.bf16.msra.mxu1 %v3506_v22  ;;  %1791 = vmatprep.subr.bf16.mxu0 %v3517_v19 }
  0xb5   :  { %1949 = vmatprep.subr.bf16.mxu1 %v3514_v25 }
  0xb7   :  { %1792 = vmatpush1.bf16.msra.mxu0 %v3515_v20 }
  0xb8   :  { %1950 = vmatpush1.bf16.msra.mxu1 %v3512_v29  ;;  %1793 = vmatprep.subr.bf16.mxu0 %v3523_v30 }
  0xb9   :  { %1951 = vmatprep.subr.bf16.mxu1 %v3520_v15 }
  0xbb   :  { %1794 = vmatpush1.bf16.msra.mxu0 %v3521_v33 }
  0xbc   :  { %1952 = vmatpush1.bf16.msra.mxu1 %v3518_v32  ;;  %1795 = vmatprep.subr.bf16.mxu0 %v3529_v34 }
  0xbd   :  { %1953 = vmatprep.subr.bf16.mxu1 %v3526_v35 }
  0xbf   :  { %1796 = vmatpush1.bf16.msra.mxu0 %v3527_v37 }
  0xc0   :  { %1954 = vmatpush1.bf16.msra.mxu1 %v3524_v36  ;;  %3046 = vmatprep.subr.bf16.mxu0 %v3533_v38 }
  0xc1   :  { %1955 = vmatprep.subr.bf16.mxu1 %v3532_v39 }
  0xc2   :  { %1798 = vmatmul.mubr.bf16.vlgmr.msra.gmra.mrb[0].mxu0 %v3758_v23 }
  0xc3   :  { %3047 = vmatpush3.bf16.msra.mxu0 %v3537_v42  ;;  %2043 = vmatprep.mubr.bf16.mxu0 %v3767_v26  ;;  %v3549_v26 = vld [vmem:[%s4705_s1 + $0x78c] ss:$20 sps:$4 sm:$0xff]  }
  0xc4   :  { %1956 = vmatpush1.bf16.msra.mxu1 %v3530_v40  ;;  %3048 = vmatprep.subr.bf16.mxu0 %v3538_v43 }
  0xc5   :  { %1957 = vmatprep.subr.bf16.mxu1 %v3536_v41 }
  0xc7   :  { %3049 = vmatpush3.bf16.msra.mxu0 %v3542_v44 }
  0xc8   :  { %1958 = vmatpush1.bf16.msra.mxu1 %v3534_v45  ;;  %3050 = vmatprep.subr.bf16.mxu0 %v3543_v46 }
  0xc9   :  { %1959 = vmatprep.subr.bf16.mxu1 %v3541_v47 }
  0xcb   :  { %3051 = vmatpush3.bf16.msra.mxu0 %v3544_v48 }
  0xcc   :  { %1960 = vmatpush1.bf16.msra.mxu1 %v3539_v49  ;;  %3052 = vmatprep.subr.bf16.mxu0 %v3545_v50 }
  0xcd   :  { %1970 = vmatprep.subr.bf16.mxu1 %v3549_v26 }
  0xcf   :  { %1962 = vmatmul.mubr.bf16.vlgmr.msra.gmra.mrb[4].mxu1 %v3758_v23  ;;  %3053 = vmatpush3.bf16.msra.mxu0 %v3546_v51 }
  0xd0   :  { %3054 = vmatprep.subr.bf16.mxu0 %v3550_v53  ;;  %1971 = vmatpush1.bf16.msra.mxu1 %v3547_v52 }
  0xd1   :  { %2002 = vmatprep.mubr.bf16.mxu1 %v3661_v3  ;;  %3068 = vmatprep.subr.bf16.mxu1 %v3553_v54 }
  0xd3   :  { %3055 = vmatpush3.bf16.msra.mxu0 %v3551_v55 }
  0xd4   :  { %3056 = vmatprep.subr.bf16.mxu0 %v3552_v56 }
  0xd5   :  { %12 = vsyncpa [#allocation3], 0  ;;  %v3558_v59 = vld [vmem:[%s4705_s1 + $0x100] ss:$20 sps:$4 sm:$0xff]   ;;  %v3555_v3 = vld [vmem:[%s4705_s1 + $0x290] ss:$20 sps:$4 sm:$0xff]  }
  0xd6   :  { %v3560_v60 = vld [vmem:[%s4705_s1 + $0x268] ss:$20 sps:$4 sm:$0xff]   ;;  %v3557_v61 = vld [vmem:[%s4705_s1 + $0x3f8] ss:$20 sps:$4 sm:$0xff]   ;;  %v3565_v0 = vld [vmem:[%s4705_s1 + $0x650] ss:$20 sps:$4 sm:$0xff]  }
  0xd7   :  { %3057 = vmatpush3.bf16.msra.mxu0 %v3554_v57  ;;  %v3562_v62 = vld [vmem:[%s4705_s1 + $0x128] ss:$20 sps:$4 sm:$0xff]   ;;  %v3559_v63 = vld [vmem:[%s4705_s1 + $0x2b8] ss:$20 sps:$4 sm:$0xff]   ;;  %v3561_v1 = vld [vmem:[%s4705_s1 + $0x420] ss:$20 sps:$4 sm:$0xff]  }
  0xd8   :  { %3058 = vmatprep.subr.bf16.mxu0 %v3556_v58  ;;  %v3567_v2 = vld [vmem:[%s4705_s1 + $0x510] ss:$20 sps:$4 sm:$0xff]   ;;  %v3563_v4 = vld [vmem:[%s4705_s1 + $0x2e0] ss:$20 sps:$4 sm:$0xff]   ;;  %v3569_v5 = vld [vmem:[%s4705_s1 + $0x678] ss:$20 sps:$4 sm:$0xff]  }
  0xd9   :  { %v3571_v9 = vld [vmem:[%s4705_s1 + $0x538] ss:$20 sps:$4 sm:$0xff]   ;;  %v3566_v10 = vld [vmem:[%s4705_s1 + $0x308] ss:$20 sps:$4 sm:$0xff]   ;;  %v3568_v12 = vld [vmem:[%s4705_s1 + $0x470] ss:$20 sps:$4 sm:$0xff]  }
  0xda   :  { %v3570_v14 = vld [vmem:[%s4705_s1 + $0x330] ss:$20 sps:$4 sm:$0xff]   ;;  %v3577_v16 = vld [vmem:[%s4705_s1 + $0x6c8] ss:$20 sps:$4 sm:$0xff]   ;;  %v3572_v18 = vld [vmem:[%s4705_s1 + $0x498] ss:$20 sps:$4 sm:$0xff]  }
  0xdb   :  { %2994 = vmatmul.mubr.msk.bf16.vlgmr.msra.gmra.mrb[4].mxu1 %vm1679_vm0, %v3771_v27  ;;  %3059 = vmatpush3.bf16.msra.mxu0 %v3558_v59  ;;  %v3579_v22 = vld [vmem:[%s4705_s1 + $0x588] ss:$20 sps:$4 sm:$0xff]   ;;  %v3574_v24 = vld [vmem:[%s4705_s1 + $0x358] ss:$20 sps:$4 sm:$0xff]   ;;  %v3581_v19 = vld [vmem:[%s4705_s1 + $0x6f0] ss:$20 sps:$4 sm:$0xff]  }
  0xdc   :  { %3069 = vmatpush3.bf16.msra.mxu1 %v3555_v3  ;;  %3060 = vmatprep.subr.bf16.mxu0 %v3560_v60  ;;  %v3576_v25 = vld [vmem:[%s4705_s1 + $0x4c0] ss:$20 sps:$4 sm:$0xff]   ;;  %v3583_v29 = vld [vmem:[%s4705_s1 + $0x5b0] ss:$20 sps:$4 sm:$0xff]   ;;  %v3584_v30 = vld [vmem:[%s4705_s1 + $0x718] ss:$20 sps:$4 sm:$0xff]  }
  0xdd   :  { %3070 = vmatprep.subr.bf16.mxu1 %v3557_v61  ;;  %2083 = vmatprep.mubr.bf16.mxu1 %v3936_v21  ;;  %v3564_v21 = vld [vmem:[%s4705_s1 + $0x448] ss:$20 sps:$4 sm:$0xff]   ;;  %v3578_v20 = vld [vmem:[%s4705_s1 + $0x380] ss:$20 sps:$4 sm:$0xff]   ;;  %v3585_v32 = vld [vmem:[%s4705_s1 + $0x5d8] ss:$20 sps:$4 sm:$0xff]  }
  0xde   :  { %v3580_v15 = vld [vmem:[%s4705_s1 + $0x4e8] ss:$20 sps:$4 sm:$0xff]   ;;  %v3586_v34 = vld [vmem:[%s4705_s1 + $0x740] ss:$20 sps:$4 sm:$0xff]   ;;  %v3590_v37 = vld [vmem:[%s4705_s1 + $0x790] ss:$20 sps:$4 sm:$0xff]  }
  0xdf   :  { %3061 = vmatpush3.bf16.msra.mxu0 %v3562_v62  ;;  %v3582_v33 = vld [vmem:[%s4705_s1 + $0x3a8] ss:$20 sps:$4 sm:$0xff]   ;;  %v3587_v35 = vld [vmem:[%s4705_s1 + $0x600] ss:$20 sps:$4 sm:$0xff]   ;;  %v3663_v38 = vmov 0.0   ;;  %vm3664_vm1 = vmmov 0  }
  0xe0   :  { %3071 = vmatpush3.bf16.msra.mxu1 %v3559_v63  ;;  %3090 = vmatprep.subr.bf16.mxu0 %v3565_v0  ;;  %v3588_v36 = vld [vmem:[%s4705_s1 + $0x768] ss:$20 sps:$4 sm:$0xff]   ;;  %v3591_v39 = vld [vmem:[%s4707_s3 + $0x40] sm:$0xff]   ;;  %v3595_v45 = vld [vmem:[%s4707_s3 + $0x50] sm:$0xff]   ;;  %vm2492_vm2 = vcmask 1043456   ;;  %vm2488_vm3 = vcmask 719872  }
  0xe1   :  { %3072 = vmatprep.subr.bf16.mxu1 %v3561_v1  ;;  %v4437_v7 = vpop.f32.mrb[0].mxu1  ;;  %v3589_v40 = vld [vmem:[%s4705_s1 + $0x628] ss:$20 sps:$4 sm:$0xff]   ;;  %v3601_v41 = vld [vmem:[%s4707_s3 + $0xc0] sm:$0xff]   ;;  %v3596_v46 = vld [vmem:[%s4707_s3 + $0x10] sm:$0xff]   ;;  %vm2685_vm4 = vcmask 982016  }
  0xe2   :  { %2044 = vmatmul.mubr.bf16.vlgmr.msra.gmra.mrb[4].mxu0 %v3929_v17  ;;  %v4439_v8 = vpop.f32.mrb[1].mxu1  ;;  %v3573_v17 = vld [vmem:[%s4705_s1 + $0x6a0] ss:$20 sps:$4 sm:$0xff]   ;;  %v3593_v43 = vld [vmem:[%s4707_s3 + $0x48] sm:$0xff]   ;;  %v3610_v55 = vld [vmem:[%s4707_s3 + $0x78] sm:$0xff]   ;;  %vm2732_vm5 = vcmask 74752  }
  0xe3   :  { %3091 = vmatpush3.bf16.msra.mxu0 %v3567_v2  ;;  %2123 = vmatprep.mubr.bf16.mxu0 %v3951_v28  ;;  %v1844_v11 = vpop.f32.mrb[2].mxu1  ;;  %v3575_v28 = vld [vmem:[%s4705_s1 + $0x560] ss:$20 sps:$4 sm:$0xff]   ;;  %v3594_v44 = vld [vmem:[%s4707_s3 + $0x8] sm:$0xff]   ;;  %v3612_v57 = vld [vmem:[%s4707_s3 + $0x38] sm:$0xff]  }
  0xe4   :  { %3073 = vmatpush3.bf16.msra.mxu1 %v3563_v4  ;;  %3092 = vmatprep.subr.bf16.mxu0 %v3569_v5  ;;  %v1845_v13 = vpop.f32.mrb[3].mxu1  ;;  %v3592_v42 = vld [vmem:[%s4707_s3] sm:$0xff]   ;;  %v3602_v49 = vld [vmem:[%s4707_s3 + $0x68] sm:$0xff]   ;;  %v3606_v51 = vld [vmem:[%s4707_s3 + $0x70] sm:$0xff]   ;;  %v327_v4 = vsub.s32 0, %v3719_v6 }
  0xe5   :  { %3074 = vmatprep.subr.bf16.mxu1 %v3564_v21  ;;  %v3599_v47 = vld [vmem:[%s4707_s3 + $0x60] sm:$0xff]   ;;  %v3604_v50 = vld [vmem:[%s4707_s3 + $0x28] sm:$0xff]   ;;  %v3608_v53 = vld [vmem:[%s4707_s3 + $0x30] sm:$0xff]   ;;  %v331_v21 = vsub.s32 1, %v3719_v6 }
  0xe6   :  { %v3600_v48 = vld [vmem:[%s4707_s3 + $0x20] sm:$0xff]   ;;  %v3605_v26 = vld [vmem:[%s4707_s3 + $0xc8] sm:$0xff]   ;;  %v3609_v54 = vld [vmem:[%s4707_s3 + $0xd0] sm:$0xff]  }
  0xe7   :  { %3093 = vmatpush3.bf16.msra.mxu0 %v3571_v9  ;;  %v3607_v52 = vld [vmem:[%s4707_s3 + $0x88] sm:$0xff]   ;;  %v3611_v56 = vld [vmem:[%s4707_s3 + $0x90] sm:$0xff]   ;;  %v3613_v58 = vld [vmem:[%s4707_s3 + $0xd8] sm:$0xff]  }
  0xe8   :  { %3075 = vmatpush3.bf16.msra.mxu1 %v3566_v10  ;;  %3094 = vmatprep.subr.bf16.mxu0 %v3573_v17  ;;  %v3614_v59 = vld [vmem:[%s4707_s3 + $0x98] sm:$0xff]   ;;  %v3615_v3 = vld [vmem:[%s4707_s3 + $0xe0] sm:$0xff]   ;;  %v3617_v61 = vld [vmem:[%s4707_s3 + $0xe8] sm:$0xff]  }
  0xe9   :  { %3076 = vmatprep.subr.bf16.mxu1 %v3568_v12  ;;  %v3616_v60 = vld [vmem:[%s4707_s3 + $0xa0] sm:$0xff]   ;;  %v3618_v62 = vld [vmem:[%s4707_s3 + $0xa8] sm:$0xff]   ;;  %v3619_v63 = vld [vmem:[%s4707_s3 + $0xf0] sm:$0xff]  }
  0xea   :  { %v3620_v0 = vld [vmem:[%s4707_s3 + $0xb0] sm:$0xff]   ;;  %v3621_v1 = vld [vmem:[%s4707_s3 + $0xf8] sm:$0xff]   ;;  %v323_v5 = vld [vmem:[%s4706_s2] sm:$0x1f] }
  0xeb   :  { %3095 = vmatpush3.bf16.msra.mxu0 %v3575_v28  ;;  %v3622_v2 = vld [vmem:[%s4707_s3 + $0xb8] sm:$0xff]   ;;  %v328_v9 = vrot.slane %v323_v5, %v327_v4  ;;  %v332_v10 = vrot.slane %v323_v5, %v331_v21  ;;  %v3629_v21 = vld [vmem:[%s4709_s5] sm:$0xff]  }
  0xec   :  { %3077 = vmatpush3.bf16.msra.mxu1 %v3570_v14  ;;  %3096 = vmatprep.subr.bf16.mxu0 %v3577_v16 }
  0xed   :  { %3078 = vmatprep.subr.bf16.mxu1 %v3572_v18 }
  0xef   :  { %3097 = vmatpush3.bf16.msra.mxu0 %v3579_v22 }
  0xf0   :  { %3079 = vmatpush3.bf16.msra.mxu1 %v3574_v24  ;;  %3098 = vmatprep.subr.bf16.mxu0 %v3581_v19 }
  0xf1   :  { %3080 = vmatprep.subr.bf16.mxu1 %v3576_v25  ;;  %v3623_v25 = vld [vmem:[%s4707_s3 + $0x100] sm:$0xff]  }
  0xf3   :  { %3099 = vmatpush3.bf16.msra.mxu0 %v3583_v29 }
  0xf4   :  { %3081 = vmatpush3.bf16.msra.mxu1 %v3578_v20  ;;  %3100 = vmatprep.subr.bf16.mxu0 %v3584_v30  ;;  %v3624_v20 = vld [vmem:[%s4707_s3 + $0x108] sm:$0xff]   ;;  %v339_v30 = vsub.s32 3, %v3719_v6 }
  0xf5   :  { %3082 = vmatprep.subr.bf16.mxu1 %v3580_v15  ;;  %v3626_v15 = vld [vmem:[%s4707_s3 + $0x118] sm:$0xff]  }
  0xf7   :  { %3101 = vmatpush3.bf16.msra.mxu0 %v3585_v32 }
  0xf8   :  { %3083 = vmatpush3.bf16.msra.mxu1 %v3582_v33  ;;  %3102 = vmatprep.subr.bf16.mxu0 %v3586_v34  ;;  %v340_v33 = vrot.slane %v323_v5, %v339_v30  ;;  %v3627_v34 = vld [vmem:[%s4707_s3 + $0x120] sm:$0xff]  }
  0xf9   :  { %3174 = vmatprep.subr.bf16.mxu1 %v3663_v38 }
  0xfb   :  { %2084 = vmatmul.mubr.bf16.vlgmr.msra.gmra.mrb[8].mxu1 %v4138_v31  ;;  %3103 = vmatpush3.bf16.msra.mxu0 %v3587_v35  ;;  %v3603_v31 = vld [vmem:[%s4707_s3 + $0x80] sm:$0xff]  }
  0xfc   :  { %3104 = vmatprep.subr.bf16.mxu0 %v3588_v36  ;;  %3175 = vmatpush3.bf16.msra.mxu1 %v3590_v37  ;;  %v3628_v36 = vld [vmem:[%s4707_s3 + $0x128] ss:$0 sps:$4 sm:$0xff]  }
  0xfd   :  { %3176 = vmatprep.mubr.msk.bf16.mxu1 %vm3664_vm1, %v3663_v38  ;;  %3114 = vmatprep.subr.bf16.mxu1 %v3591_v39 }
  0xff   :  { %3105 = vmatpush3.bf16.msra.mxu0 %v3589_v40 }
 0x100   :  { %3136 = vmatprep.subr.bf16.mxu0 %v3601_v41 }
 0x102   :  { %2124 = vmatmul.mubr.bf16.vlgmr.msra.gmra.mrb[8].mxu0 %v3758_v23  ;;  %v3597_v23 = vld [vmem:[%s4707_s3 + $0x58] sm:$0xff]  }
 0x103   :  { %3177 = vmatmul.mubr.msk.bf16.vlgmr.msra.gmra.mrb[12].mxu1 %vm1679_vm0, %v3771_v27  ;;  %3137 = vmatpush3.bf16.msra.mxu0 %v3603_v31  ;;  %v3598_v27 = vld [vmem:[%s4707_s3 + $0x18] sm:$0xff]  }
 0x104   :  { %3115 = vmatpush3.bf16.msra.mxu1 %v3592_v42  ;;  %3138 = vmatprep.subr.bf16.mxu0 %v3605_v26 }
 0x105   :  { %3116 = vmatprep.subr.bf16.mxu1 %v3593_v43 }
 0x107   :  { %3139 = vmatpush3.bf16.msra.mxu0 %v3607_v52 }
 0x108   :  { %3117 = vmatpush3.bf16.msra.mxu1 %v3594_v44  ;;  %3140 = vmatprep.subr.bf16.mxu0 %v3609_v54  ;;  %v2494_v44 = vsel %vm2492_vm2, %v3628_v36, 0 }
 0x109   :  { %3118 = vmatprep.subr.bf16.mxu1 %v3595_v45 }
 0x10b   :  { %3141 = vmatpush3.bf16.msra.mxu0 %v3611_v56 }
 0x10c   :  { %3119 = vmatpush3.bf16.msra.mxu1 %v3596_v46  ;;  %3142 = vmatprep.subr.bf16.mxu0 %v3613_v58 }
 0x10d   :  { %3120 = vmatprep.subr.bf16.mxu1 %v3597_v23 }
 0x10f   :  { %3143 = vmatpush3.bf16.msra.mxu0 %v3614_v59 }
 0x110   :  { %3121 = vmatpush3.bf16.msra.mxu1 %v3598_v27  ;;  %3144 = vmatprep.subr.bf16.mxu0 %v3615_v3 }
 0x111   :  { %3122 = vmatprep.subr.bf16.mxu1 %v3599_v47 }
 0x113   :  { %3145 = vmatpush3.bf16.msra.mxu0 %v3616_v60 }
 0x114   :  { %3123 = vmatpush3.bf16.msra.mxu1 %v3600_v48  ;;  %3146 = vmatprep.subr.bf16.mxu0 %v3617_v61 }
 0x115   :  { %3124 = vmatprep.subr.bf16.mxu1 %v3602_v49 }
 0x117   :  { %3147 = vmatpush3.bf16.msra.mxu0 %v3618_v62 }
 0x118   :  { %3125 = vmatpush3.bf16.msra.mxu1 %v3604_v50  ;;  %3148 = vmatprep.subr.bf16.mxu0 %v3619_v63  ;;  %v343_v50 = vsub.s32 4, %v3719_v6 }
 0x119   :  { %3126 = vmatprep.subr.bf16.mxu1 %v3606_v51 }
 0x11a   :  { %v344_v26 = vrot.slane %v323_v5, %v343_v50 }
 0x11b   :  { %3149 = vmatpush3.bf16.msra.mxu0 %v3620_v0 }
 0x11c   :  { %3127 = vmatpush3.bf16.msra.mxu1 %v3608_v53  ;;  %3150 = vmatprep.subr.bf16.mxu0 %v3621_v1 }
 0x11d   :  { %3128 = vmatprep.subr.bf16.mxu1 %v3610_v55 }
 0x11f   :  { %3151 = vmatpush3.bf16.msra.mxu0 %v3622_v2 }
 0x120   :  { %3129 = vmatpush3.bf16.msra.mxu1 %v3612_v57  ;;  %3196 = vmatprep.subr.bf16.mxu0 %v3663_v38 }
 0x121   :  { %3180 = vmatprep.subr.bf16.mxu1 %v3663_v38 }
 0x195   :  { %v1799_v11 = vpop.f32.mrb[0].mxu0 }
 0x196   :  { %v3216_v17 = vadd.f32 %v1799_v11, %v328_v9  ;;  %v1801_v12 = vpop.f32.mrb[1].mxu0  ;;  %v3630_v9 = vld [vmem:[%s4709_s5 + $0x8] sm:$0xff]   ;;  %v3632_v11 = vld [vmem:[%s4709_s5 + $0x18] sm:$0xff]  }
 0x197   :  { %v3218_v13 = vadd.f32 %v1801_v12, %v332_v10  ;;  %v1803_v28 = vpop.f32.mrb[2].mxu0  ;;  %v3631_v10 = vld [vmem:[%s4709_s5 + $0x10] sm:$0xff]   ;;  %v3634_v12 = vld [vmem:[%s4709_s5 + $0x28] sm:$0xff]  }
 0x198   :  { %v3217_v14 = vadd.f32 %v3216_v17, %v4437_v7  ;;  %v1804_v16 = vpop.f32.mrb[3].mxu0  ;;  %v3625_v7 = vld [vmem:[%s4707_s3 + $0x110] sm:$0xff]   ;;  %v3633_v17 = vld [vmem:[%s4709_s5 + $0x20] sm:$0xff]   ;;  %v3636_v28 = vld [vmem:[%s4709_s5 + $0x38] ss:$0 sps:$4 sm:$0xff]  }
 0x199   :  { %v3219_v18 = vadd.f32 %v3218_v13, %v4439_v8  ;;  %v335_v8 = vsub.s32 2, %v3719_v6  ;;  %v3635_v13 = vld [vmem:[%s4709_s5 + $0x30] sm:$0xff]  }
 0x19a   :  { %v2171_v22 = vmax.f32 %v3217_v14, 0.0  ;;  %v2690_v14 = vsel %vm2492_vm2, %v3636_v28, 0 }
 0x19b   :  { %v2172_v24 = vmax.f32 %v3219_v18, 0.0  ;;  %v336_v32 = vrot.slane %v323_v5, %v335_v8 }
 0x19c   :  { %v2176_v29 = vpack.c.bf16 %v2171_v22, %v2171_v22 }
 0x19d   :  { %v2177_v19 = vpack.c.bf16 %v2172_v24, %v2172_v24 }
 0x19f   :  { %2528 = vmatprep.mubr.bf16.mxu1 %v2177_v19 }
 0x1a0   :  { %2529 = vmatmul.mubr.bf16.vlgmr.msra.gmra.mrb[16].mxu1 %v2176_v29 }
 0x1a1   :  { %3181 = vmatpush3.bf16.msra.mxu1 %v3623_v25  ;;  %3192 = vmatprep.mubr.msk.bf16.mxu1 %vm3664_vm1, %v3663_v38  ;;  %v2996_v25 = vld [vmem:[%s4708_s4] ss:$0 sm:$0xff]  ;;  %s3665_s4 = smov [#allocation2]  }
 0x1a2   :  { %3182 = vmatprep.subr.bf16.mxu1 %v3663_v38  ;;  %s2740_s30 = sshll.u32 %s3665_s4, 4  ;;  %s2741_s30 = int_to_ptr.vmem [resolvable:$true] %s2740_s30 }
 0x1a3   :  { %s3637_s8 = scalar_lea.vmem %s2741_s30, 32  ;;  %p3642_p1 = scmp.lt.s32.totalorder %s2741_s30, %s2741_s30 }
 0x1a4   :  { %p3638_p0 = scmp.ne.s32.totalorder %s2741_s30, %s3637_s8  ;;  %p3643_p2 = scmp.lt.s32.totalorder %s3637_s8, %s3637_s8 }
 0x1a5   :  { %3183 = vmatpush3.bf16.msra.mxu1 %v3624_v20 }
 0x1a6   :  { %3184 = vmatprep.subr.bf16.mxu1 %v3663_v38  ;;  %p3644_p3 = por %p3643_p2, %p3642_p1 }
 0x1a8   :  { %p3645_p4 = pnand %p3644_p3, %p3638_p0 }
 0x1a9   :  { %3185 = vmatpush3.bf16.msra.mxu1 %v3625_v7 }
 0x1aa   :  { %3186 = vmatprep.subr.bf16.mxu1 %v3663_v38 }
 0x1ad   :  { %3187 = vmatpush3.bf16.msra.mxu1 %v3626_v15 }
 0x1ae   :  { %v2004_v35 = vpop.f32.mrb[4].mxu1  ;;  %3188 = vmatprep.subr.bf16.mxu1 %v3663_v38 }
 0x1af   :  { %v3220_v37 = vadd.f32 %v2004_v35, %v336_v32  ;;  %v2006_v39 = vpop.f32.mrb[5].mxu1 }
 0x1b0   :  { %v3221_v40 = vadd.f32 %v2006_v39, %v340_v33  ;;  %v2008_v41 = vpop.f32.mrb[6].mxu1 }
 0x1b1   :  { %v2173_v31 = vmax.f32 %v3220_v37, 0.0  ;;  %v2009_v42 = vpop.f32.mrb[7].mxu1  ;;  %3189 = vmatpush3.bf16.msra.mxu1 %v3627_v34 }
 0x1b2   :  { %v2174_v43 = vmax.f32 %v3221_v40, 0.0  ;;  %3190 = vmatprep.subr.bf16.mxu1 %v3663_v38  ;;  %v3036_v40 = vld [vmem:[%s4710_s6] ss:$0 sm:$0xff] }
 0x1b3   :  { %v2178_v46 = vpack.c.bf16 %v2173_v31, %v2173_v31 }
 0x1b4   :  { %v2179_v45 = vpack.c.bf16 %v2174_v43, %v2174_v43 }
 0x1b5   :  { %v3062_v23 = vpop.f32.mrb[4].mxu0  ;;  %3191 = vmatpush3.bf16.msra.mxu1 %v2494_v44 }
 0x1b6   :  { %2568 = vmatprep.mubr.bf16.mxu0 %v2179_v45  ;;  %v3063_v27 = vpop.f32.mrb[5].mxu0 }
 0x1b7   :  { %2569 = vmatmul.mubr.bf16.vlgmr.msra.gmra.mrb[12].mxu0 %v2178_v46  ;;  %v3064_v47 = vadd.f32 %v3063_v27, %v3062_v23  ;;  %v3065_v48 = vpop.f32.mrb[6].mxu0 }
 0x1b8   :  { %v3066_v49 = vpop.f32.mrb[7].mxu0  ;;  %3212 = vmatprep.mubr.msk.bf16.mxu0 %vm3664_vm1, %v3663_v38  ;;  %3197 = vmatpush3.bf16.msra.mxu0 %v3629_v21 }
 0x1b9   :  { %v2046_v53 = vadd.f32 %v3064_v47, %v344_v26  ;;  %3198 = vmatprep.subr.bf16.mxu0 %v3663_v38 }
 0x1bc   :  { %3199 = vmatpush3.bf16.msra.mxu0 %v3630_v9 }
 0x1bd   :  { %3200 = vmatprep.subr.bf16.mxu0 %v3663_v38 }
 0x1c0   :  { %3201 = vmatpush3.bf16.msra.mxu0 %v3631_v10 }
 0x1c1   :  { %3202 = vmatprep.subr.bf16.mxu0 %v3663_v38 }
 0x1c4   :  { %3203 = vmatpush3.bf16.msra.mxu0 %v3632_v11 }
 0x1c5   :  { %3204 = vmatprep.subr.bf16.mxu0 %v3663_v38 }
 0x1c8   :  { %3205 = vmatpush3.bf16.msra.mxu0 %v3633_v17 }
 0x1c9   :  { %3206 = vmatprep.subr.bf16.mxu0 %v3663_v38 }
 0x1cc   :  { %3207 = vmatpush3.bf16.msra.mxu0 %v3634_v12 }
 0x1cd   :  { %3208 = vmatprep.subr.bf16.mxu0 %v3663_v38 }
 0x1ce   :  { %v3084_v51 = vpop.f32.mrb[8].mxu1 }
 0x1cf   :  { %v3085_v52 = vpop.f32.mrb[9].mxu1 }
 0x1d0   :  { %v3086_v54 = vadd.f32 %v3085_v52, %v3084_v51  ;;  %v3087_v55 = vpop.f32.mrb[10].mxu1  ;;  %3209 = vmatpush3.bf16.msra.mxu0 %v3635_v13 }
 0x1d1   :  { %v3088_v56 = vpop.f32.mrb[11].mxu1  ;;  %3210 = vmatprep.subr.bf16.mxu0 %v3663_v38 }
 0x1d2   :  { %v2086_v57 = vadd.f32 %v3086_v54, %v2046_v53 }
 0x1d4   :  { %3211 = vmatpush3.bf16.msra.mxu0 %v2690_v14 }
 0x1d5   :  { %v3106_v58 = vpop.f32.mrb[8].mxu0 }
 0x1d6   :  { %v3107_v59 = vpop.f32.mrb[9].mxu0  ;;  %v2165_v3 = vpop.f32.mrb[12].mxu1 }
 0x1d7   :  { %v3108_v60 = vadd.f32 %v3107_v59, %v3106_v58  ;;  %v3109_v61 = vpop.f32.mrb[10].mxu0  ;;  %v3178_v62 = vpop.f32.mrb[13].mxu1 }
 0x1d8   :  { %v3110_v63 = vpop.f32.mrb[11].mxu0  ;;  %v2168_v0 = vpop.f32.mrb[14].mxu1 }
 0x1d9   :  { %v2126_v1 = vadd.f32 %v3108_v60, %v2086_v57  ;;  %v3179_v2 = vpop.f32.mrb[15].mxu1 }
 0x1db   :  { %v2166_v4 = vadd.f32 %v2165_v3, %v2126_v1 }
 0x1dd   :  { %v2175_v6 = vmax.f32 %v2166_v4, 0.0 }
 0x1df   :  { %v2180_v5 = vpack.c.bf16 %v2175_v6, %v2175_v6 }
 0x1e1   :  { %3193 = vmatmul.mubr.msk.bf16.vlgmr.msra.gmra.mrb[20].mxu1 %vm2488_vm3, %v2180_v5 }
 0x273   :  { %v3130_v16 = vpop.f32.mrb[16].mxu1 }
 0x274   :  { %v3131_v18 = vpop.f32.mrb[17].mxu1 }
 0x275   :  { %v3132_v22 = vadd.f32 %v3131_v18, %v3130_v16  ;;  %v3133_v24 = vpop.f32.mrb[18].mxu1 }
 0x276   :  { %v3134_v19 = vpop.f32.mrb[19].mxu1 }
 0x277   :  { %v2531_v7 = vadd.f32 %v3132_v22, %v2996_v25 }
 0x28a   :  { %v3152_v29 = vpop.f32.mrb[12].mxu0 }
 0x28b   :  { %v3153_v20 = vpop.f32.mrb[13].mxu0 }
 0x28c   :  { %v3154_v38 = vadd.f32 %v3153_v20, %v3152_v29  ;;  %v3155_v8 = vpop.f32.mrb[14].mxu0 }
 0x28d   :  { %v3156_v30 = vpop.f32.mrb[15].mxu0 }
 0x28e   :  { %v2571_v15 = vadd.f32 %v3154_v38, %v2531_v7 }
 0x2b4   :  { %v2610_v32 = vpop.f32.mrb[20].mxu1 }
 0x2b5   :  { %v2611_v33 = vadd.f32 %v2610_v32, %v2571_v15  ;;  %v3194_v34 = vpop.f32.mrb[21].mxu1 }
 0x2b6   :  { %v2613_v35 = vpop.f32.mrb[22].mxu1 }
 0x2b7   :  { %v2616_v36 = vmax.f32 %v2611_v33, 0.0  ;;  %v3195_v37 = vpop.f32.mrb[23].mxu1 }
 0x2b9   :  { %v2617_v39 = vpack.c.bf16 %v2616_v36, %v2616_v36 }
 0x2bb   :  { %3213 = vmatmul.mubr.msk.bf16.vlgmr.msra.gmra.mrb[16].mxu0 %vm2685_vm4, %v2617_v39 }
 0x38e   :  { %v2726_v41 = vpop.f32.mrb[16].mxu0 }
 0x38f   :  { %v2727_v31 = vadd.f32 %v3036_v40, %v2726_v41  ;;  %v3214_v42 = vpop.f32.mrb[17].mxu0 }
 0x390   :  { %v2729_v43 = vpop.f32.mrb[18].mxu0 }
 0x391   :  { %v3215_v44 = vpop.f32.mrb[19].mxu0  ;;  %2733 = vst.msk [vmem:[#allocation2] sm:$0x3] %vm2732_vm5, %v2727_v31 }
 0x392   :  { %3648 = shalt.err (!%p3645_p4)
}
 0x393   :  { %s3649_s6 = scalar_lea.hbm %s4711_s7, 32 }
 0x394   :  { %p3650_p5 = scmp.ne.s32.totalorder %s4711_s7, %s3649_s6  ;;  %p3653_p6 = scmp.lt.u32.totalorder %s3649_s6, %s4711_s7 }
 0x396   :  { %p3655_p7 = pnand %p3653_p6, %p3650_p5 }
 0x398   :  { %3658 = shalt.err (!%p3655_p7)
}
 0x399   :  { %2743 = dma.vmem_to_hbm [thread:$0]  %s2741_s30, 32, %s4711_s7, [#allocation3]  }
 0x39a   :  { %3659 = dma.done.wait [#allocation3], 32  }
 0x39b   :  { %3660 = vsyncadd [#allocation3], 4294967264 }
 0x39c   :  { %2747 = vsyncpa [#allocation3], 1 }

</bundles_post_ra>
